<compile_context>
chip_gen: v5e
topology: v5e:2x2
jax: 0.10.0
libtpu: 0.0.40
codegen_flags: <defaults>
</compile_context>

<pallas_src>
import jax
import jax.numpy as jnp
from jax.experimental import pallas as pl
from jax.experimental.pallas import tpu as pltpu

BN_EPS = 1e-5


def _mlp_wrapper_kernel(x_ref, w1_ref, w2_ref, w3o_ref, bn_ref, b3o_ref, out_ref):
    """Fused forward:
       h = relu(BN1(x @ W1))        # pre-BN bias folded away (cancelled by mean-sub)
       h = relu(BN2(h @ W2))
       y = h @ W3o + b3o            # W3o = W3 @ Wo, b3o = b3 @ Wo + bo (pre-folded)
    bn_ref rows: [g1; be1; g2; be2], each a (1, hidden) per-feature vector.
    """
    x = x_ref[...].astype(jnp.float32)
    inv_b = 1.0 / x.shape[0]

    def bn_relu(h, g, be):
        # Single-pass batch statistics (sum and sum of squares).
        s = jnp.sum(h, axis=0, keepdims=True)
        sq = jnp.sum(h * h, axis=0, keepdims=True)
        mean = s * inv_b
        var = jnp.maximum(sq * inv_b - mean * mean, 0.0)  # clamp cancellation
        inv = jax.lax.rsqrt(var + BN_EPS)
        # Fold normalize + affine into one per-feature scale/shift.
        scale = inv * g
        shift = be - mean * scale
        return jnp.maximum(h * scale + shift, 0.0)

    h = bn_relu(jnp.dot(x, w1_ref[...], preferred_element_type=jnp.float32),
                bn_ref[0:1, :], bn_ref[1:2, :])
    h = bn_relu(jnp.dot(h, w2_ref[...], preferred_element_type=jnp.float32),
                bn_ref[2:3, :], bn_ref[3:4, :])
    y = jnp.dot(h, w3o_ref[...], preferred_element_type=jnp.float32) + b3o_ref[...]
    out_ref[...] = y.astype(out_ref.dtype)


def prepare_params(params):
    """One-time parameter prep (run once, OUTSIDE the per-call path):
       - fold the last two linears:  W3o = W3 @ Wo,  b3o = b3 @ Wo + bo
       - pack the four BN per-feature vectors into one [4, hidden] operand
       - drop b1/b2 (exactly cancelled by training-mode BN mean subtraction)
    """
    w3o = jnp.dot(params["w3"], params["wo"], precision=jax.lax.Precision.HIGHEST)
    b3o = (jnp.dot(params["b3"], params["wo"], precision=jax.lax.Precision.HIGHEST)
           + params["bo"])
    bn_pack = jnp.concatenate(
        [params["g1"], params["be1"], params["g2"], params["be2"]], axis=0)
    return dict(w1=params["w1"], w2=params["w2"], w3o=w3o, b3o=b3o, bn=bn_pack)


@jax.jit
def mlp_wrapper_forward(x, prepared):
    """x: [B, input_dim] f32.  prepared: output of prepare_params (pre-folded)."""
    B, input_dim = x.shape
    hidden = prepared["w1"].shape[1]
    out_dim = prepared["w3o"].shape[1]

    operands = (x, prepared["w1"], prepared["w2"], prepared["w3o"],
                prepared["bn"], prepared["b3o"])

    # Whole problem in one block (no grid): every operand is tiny and the full
    # batch must be resident for exact BN statistics.
    in_specs = [pl.BlockSpec(memory_space=pltpu.MemorySpace.VMEM) for _ in operands]
    out_spec = pl.BlockSpec(memory_space=pltpu.MemorySpace.VMEM)

    flops = 2 * B * (input_dim * hidden + hidden * hidden + hidden * out_dim)
    bytes_accessed = 4 * (sum(int(o.size) for o in operands) + B * out_dim)
    cost = pl.CostEstimate(flops=flops, transcendentals=2 * hidden,
                           bytes_accessed=bytes_accessed)

    return pl.pallas_call(
        _mlp_wrapper_kernel,
        out_shape=jax.ShapeDtypeStruct((B, out_dim), jnp.float32),
        in_specs=in_specs,
        out_specs=out_spec,
        cost_estimate=cost,
    )(*operands)


def init_params(key, input_dim, hidden_dim, output_dim, out_dim):
    """Deterministic synthetic parameters (weights in (in, out) layout)."""
    ks = jax.random.split(key, 8)

    def lin(k, din, dout):
        kw, kb = jax.random.split(k)
        bound = 1.0 / jnp.sqrt(din)
        w = jax.random.uniform(kw, (din, dout), jnp.float32, -bound, bound)
        b = jax.random.uniform(kb, (1, dout), jnp.float32, -bound, bound)
        return w, b

    w1, b1 = lin(ks[0], input_dim, hidden_dim)
    w2, b2 = lin(ks[1], hidden_dim, hidden_dim)
    w3, b3 = lin(ks[2], hidden_dim, output_dim)
    wo, bo = lin(ks[3], output_dim, out_dim)

    # BatchNorm1d affine params (slightly non-trivial but deterministic).
    g1 = 1.0 + 0.1 * jax.random.normal(ks[4], (1, hidden_dim), jnp.float32)
    be1 = 0.1 * jax.random.normal(ks[5], (1, hidden_dim), jnp.float32)
    g2 = 1.0 + 0.1 * jax.random.normal(ks[6], (1, hidden_dim), jnp.float32)
    be2 = 0.1 * jax.random.normal(ks[7], (1, hidden_dim), jnp.float32)

    return dict(
        w1=w1, b1=b1, g1=g1, be1=be1,
        w2=w2, b2=b2, g2=g2, be2=be2,
        w3=w3, b3=b3,
        wo=wo, bo=bo,
    )


def reference_forward(x, params):
    """Plain-JAX reference matching the PyTorch forward (training-mode BN).
    Uses the un-folded weights and the original biases (they cancel in BN)."""
    def bn_relu(h, g, be):
        mean = jnp.mean(h, axis=0, keepdims=True)
        var = jnp.mean((h - mean) ** 2, axis=0, keepdims=True)  # biased variance
        return jnp.maximum((h - mean) / jnp.sqrt(var + BN_EPS) * g + be, 0.0)

    h = bn_relu(x @ params["w1"] + params["b1"], params["g1"], params["be1"])
    h = bn_relu(h @ params["w2"] + params["b2"], params["g2"], params["be2"])
    h = h @ params["w3"] + params["b3"]
    return h @ params["wo"] + params["bo"]


if __name__ == "__main__":
    # MLP(num_layers=3, input_dim=16, hidden_dim=32, output_dim=24),
    # MLPWrapper(out_dim=8, mlp=mlp); batch=8.
    B, INPUT_DIM, HIDDEN_DIM, OUTPUT_DIM, OUT_DIM = 8, 16, 32, 24, 8

    key = jax.random.PRNGKey(0)
    k_x, k_p = jax.random.split(key)
    x = jax.random.normal(k_x, (B, INPUT_DIM), jnp.float32)
    params = init_params(k_p, INPUT_DIM, HIDDEN_DIM, OUTPUT_DIM, OUT_DIM)

    # One-time prep (outside the per-call path): fold last two linears, pack
    # BN vectors. Block so prep cost is not attributed to the forward call.
    prepared = jax.block_until_ready(prepare_params(params))

    y = mlp_wrapper_forward(x, prepared)
    y = jax.block_until_ready(y)

    y_ref = reference_forward(x, params)
    assert y.shape == (B, OUT_DIM)
    assert jnp.allclose(y, y_ref, atol=1e-4, rtol=1e-4), "mismatch vs JAX reference"

    print("KERNEL_OK")
</pallas_src>

<mosaic_0001>
module attributes {stable_mosaic.version = 11 : i64} {
  func.func @_mlp_wrapper_kernel(%arg0: memref<8x16xf32, #tpu.memory_space<vmem>>, %arg1: memref<16x32xf32, #tpu.memory_space<vmem>>, %arg2: memref<32x32xf32, #tpu.memory_space<vmem>>, %arg3: memref<32x8xf32, #tpu.memory_space<vmem>>, %arg4: memref<4x32xf32, #tpu.memory_space<vmem>>, %arg5: memref<1x8xf32, #tpu.memory_space<vmem>>, %arg6: memref<8x8xf32, #tpu.memory_space<vmem>>) attributes {dimension_semantics = [], scalar_prefetch = 0 : i64, scratch_operands = 0 : i64, tpu.core_type = #tpu.core_type<tc>} {
    %c0 = arith.constant 0 : index
    %c0_0 = arith.constant 0 : index
    %0 = vector.load %arg0[%c0, %c0_0] : memref<8x16xf32, #tpu.memory_space<vmem>>, vector<8x16xf32>
    %c0_1 = arith.constant 0 : index
    %c0_2 = arith.constant 0 : index
    %1 = vector.load %arg1[%c0_1, %c0_2] : memref<16x32xf32, #tpu.memory_space<vmem>>, vector<16x32xf32>
    %cst = arith.constant dense<0.000000e+00> : vector<8x32xf32>
    %2 = tpu.matmul %0, %1, %cst {dimension_numbers = #tpu.dot_dimension_numbers<[1], [0], [0], [1], [0, 0, 1, 1], [], []>} : vector<8x16xf32>, vector<16x32xf32>, vector<8x32xf32> -> vector<8x32xf32>
    %c0_3 = arith.constant 0 : index
    %c0_4 = arith.constant 0 : index
    %3 = vector.load %arg4[%c0_3, %c0_4] : memref<4x32xf32, #tpu.memory_space<vmem>>, vector<1x32xf32>
    %c1 = arith.constant 1 : index
    %c0_5 = arith.constant 0 : index
    %4 = vector.load %arg4[%c1, %c0_5] : memref<4x32xf32, #tpu.memory_space<vmem>>, vector<1x32xf32>
    %cst_6 = arith.constant dense<0.000000e+00> : vector<32xf32>
    %5 = vector.multi_reduction <add>, %2, %cst_6 [0] : vector<8x32xf32> to vector<32xf32>
    %6 = vector.shape_cast %5 : vector<32xf32> to vector<1x32xf32>
    %7 = arith.mulf %2, %2 : vector<8x32xf32>
    %cst_7 = arith.constant dense<0.000000e+00> : vector<32xf32>
    %8 = vector.multi_reduction <add>, %7, %cst_7 [0] : vector<8x32xf32> to vector<32xf32>
    %9 = vector.shape_cast %8 : vector<32xf32> to vector<1x32xf32>
    %cst_8 = arith.constant 1.250000e-01 : f32
    %10 = vector.broadcast %cst_8 : f32 to vector<1x32xf32>
    %11 = arith.mulf %6, %10 : vector<1x32xf32>
    %cst_9 = arith.constant 1.250000e-01 : f32
    %12 = vector.broadcast %cst_9 : f32 to vector<1x32xf32>
    %13 = arith.mulf %9, %12 : vector<1x32xf32>
    %14 = arith.mulf %11, %11 : vector<1x32xf32>
    %15 = arith.subf %13, %14 : vector<1x32xf32>
    %cst_10 = arith.constant 0.000000e+00 : f32
    %16 = vector.broadcast %cst_10 : f32 to vector<1x32xf32>
    %17 = arith.maximumf %15, %16 : vector<1x32xf32>
    %cst_11 = arith.constant 9.99999974E-6 : f32
    %18 = vector.broadcast %cst_11 : f32 to vector<1x32xf32>
    %19 = arith.addf %17, %18 : vector<1x32xf32>
    %20 = math.rsqrt %19 : vector<1x32xf32>
    %21 = arith.mulf %20, %3 : vector<1x32xf32>
    %22 = arith.mulf %11, %21 : vector<1x32xf32>
    %23 = arith.subf %4, %22 : vector<1x32xf32>
    %24 = vector.broadcast %21 : vector<1x32xf32> to vector<8x32xf32>
    %25 = arith.mulf %2, %24 : vector<8x32xf32>
    %26 = vector.broadcast %23 : vector<1x32xf32> to vector<8x32xf32>
    %27 = arith.addf %25, %26 : vector<8x32xf32>
    %cst_12 = arith.constant 0.000000e+00 : f32
    %28 = vector.broadcast %cst_12 : f32 to vector<8x32xf32>
    %29 = arith.maximumf %27, %28 : vector<8x32xf32>
    %c0_13 = arith.constant 0 : index
    %c0_14 = arith.constant 0 : index
    %30 = vector.load %arg2[%c0_13, %c0_14] : memref<32x32xf32, #tpu.memory_space<vmem>>, vector<32x32xf32>
    %cst_15 = arith.constant dense<0.000000e+00> : vector<8x32xf32>
    %31 = tpu.matmul %29, %30, %cst_15 {dimension_numbers = #tpu.dot_dimension_numbers<[1], [0], [0], [1], [0, 0, 1, 1], [], []>} : vector<8x32xf32>, vector<32x32xf32>, vector<8x32xf32> -> vector<8x32xf32>
    %c2 = arith.constant 2 : index
    %c0_16 = arith.constant 0 : index
    %32 = vector.load %arg4[%c2, %c0_16] : memref<4x32xf32, #tpu.memory_space<vmem>>, vector<1x32xf32>
    %c3 = arith.constant 3 : index
    %c0_17 = arith.constant 0 : index
    %33 = vector.load %arg4[%c3, %c0_17] : memref<4x32xf32, #tpu.memory_space<vmem>>, vector<1x32xf32>
    %cst_18 = arith.constant dense<0.000000e+00> : vector<32xf32>
    %34 = vector.multi_reduction <add>, %31, %cst_18 [0] : vector<8x32xf32> to vector<32xf32>
    %35 = vector.shape_cast %34 : vector<32xf32> to vector<1x32xf32>
    %36 = arith.mulf %31, %31 : vector<8x32xf32>
    %cst_19 = arith.constant dense<0.000000e+00> : vector<32xf32>
    %37 = vector.multi_reduction <add>, %36, %cst_19 [0] : vector<8x32xf32> to vector<32xf32>
    %38 = vector.shape_cast %37 : vector<32xf32> to vector<1x32xf32>
    %cst_20 = arith.constant 1.250000e-01 : f32
    %39 = vector.broadcast %cst_20 : f32 to vector<1x32xf32>
    %40 = arith.mulf %35, %39 : vector<1x32xf32>
    %cst_21 = arith.constant 1.250000e-01 : f32
    %41 = vector.broadcast %cst_21 : f32 to vector<1x32xf32>
    %42 = arith.mulf %38, %41 : vector<1x32xf32>
    %43 = arith.mulf %40, %40 : vector<1x32xf32>
    %44 = arith.subf %42, %43 : vector<1x32xf32>
    %cst_22 = arith.constant 0.000000e+00 : f32
    %45 = vector.broadcast %cst_22 : f32 to vector<1x32xf32>
    %46 = arith.maximumf %44, %45 : vector<1x32xf32>
    %cst_23 = arith.constant 9.99999974E-6 : f32
    %47 = vector.broadcast %cst_23 : f32 to vector<1x32xf32>
    %48 = arith.addf %46, %47 : vector<1x32xf32>
    %49 = math.rsqrt %48 : vector<1x32xf32>
    %50 = arith.mulf %49, %32 : vector<1x32xf32>
    %51 = arith.mulf %40, %50 : vector<1x32xf32>
    %52 = arith.subf %33, %51 : vector<1x32xf32>
    %53 = vector.broadcast %50 : vector<1x32xf32> to vector<8x32xf32>
    %54 = arith.mulf %31, %53 : vector<8x32xf32>
    %55 = vector.broadcast %52 : vector<1x32xf32> to vector<8x32xf32>
    %56 = arith.addf %54, %55 : vector<8x32xf32>
    %cst_24 = arith.constant 0.000000e+00 : f32
    %57 = vector.broadcast %cst_24 : f32 to vector<8x32xf32>
    %58 = arith.maximumf %56, %57 : vector<8x32xf32>
    %c0_25 = arith.constant 0 : index
    %c0_26 = arith.constant 0 : index
    %59 = vector.load %arg3[%c0_25, %c0_26] : memref<32x8xf32, #tpu.memory_space<vmem>>, vector<32x8xf32>
    %cst_27 = arith.constant dense<0.000000e+00> : vector<8x8xf32>
    %60 = tpu.matmul %58, %59, %cst_27 {dimension_numbers = #tpu.dot_dimension_numbers<[1], [0], [0], [1], [0, 0, 1, 1], [], []>} : vector<8x32xf32>, vector<32x8xf32>, vector<8x8xf32> -> vector<8x8xf32>
    %c0_28 = arith.constant 0 : index
    %c0_29 = arith.constant 0 : index
    %61 = vector.load %arg5[%c0_28, %c0_29] : memref<1x8xf32, #tpu.memory_space<vmem>>, vector<1x8xf32>
    %62 = vector.broadcast %61 : vector<1x8xf32> to vector<8x8xf32>
    %63 = arith.addf %60, %62 : vector<8x8xf32>
    %c0_30 = arith.constant 0 : index
    %c0_31 = arith.constant 0 : index
    %64 = vector.load %arg6[%c0_30, %c0_31] : memref<8x8xf32, #tpu.memory_space<vmem>>, vector<8x8xf32>
    tpu.vector_store %arg6[%c0_30, %c0_31], %63 {strides = array<i32>} : memref<8x8xf32, #tpu.memory_space<vmem>>, vector<8x8xf32>,
    return
  }
}

</mosaic_0001>

<bundles_post_ra>
// kernel: mlp_wrapper_forward.1
= control target key start
LH: loop header
LB: loop body
LE: loop exit
PB: predicated region body
PF: predicated region fallthrough
CT: control target
= control target key end

     0   :  { %11 = vsyncpa [#allocation3], 0  ;;  %s418_s0 = inlined_call_operand.vmem [shape: f32[8,16], index: 0, kind: input, shape index: {}]   ;;  %s419_s1 = inlined_call_operand.hbm [shape: f32[16,32], index: 1, kind: input, shape index: {}]   ;;  %s420_s2 = inlined_call_operand.vmem [shape: f32[32,32], index: 2, kind: input, shape index: {}]   ;;  %s421_s3 = inlined_call_operand.vmem [shape: f32[32,8], index: 3, kind: input, shape index: {}]   ;;  %s422_s4 = inlined_call_operand.hbm [shape: f32[4,32], index: 4, kind: input, shape index: {}]   ;;  %s423_s5 = inlined_call_operand.vmem [shape: f32[1,8], index: 5, kind: input, shape index: {}]   ;;  %s424_s6 = inlined_call_operand.hbm [shape: f32[8,8], index: 6, kind: output, shape index: {}]  }
   0x1   :  { %12 = vsyncpa [#allocation6], 0 }
   0x2   :  { %13 = vsyncpa [#allocation4], 0  ;;  %s20_s23 = sshll.u32 %s419_s1, 4  ;;  %s333_s24 = smov [#allocation2]   ;;  %s21_s23 = int_to_ptr.hbm [resolvable:$true] %s20_s23 }
   0x3   :  { %s22_s25 = sshll.u32 %s333_s24, 4  ;;  %s38_s28 = sshll.u32 %s422_s4, 4  ;;  %s23_s25 = int_to_ptr.vmem [resolvable:$true] %s22_s25  ;;  %s39_s28 = int_to_ptr.hbm [resolvable:$true] %s38_s28 }
   0x4   :  { %s334_s29 = smov 128   ;;  %s335_s30 = smov 8  }
   0x5   :  { %28 = dma.hbm_to_vmem [thread:$0]  %s21_s23, 256, %s23_s25, [#allocation3], %s334_s29, %s334_s29, %s335_s30  }
   0x6   :  { %s336_s7 = smov [#allocation5]  }
   0x7   :  { %s40_s8 = sshll.u32 %s336_s7, 4  ;;  %s41_s8 = int_to_ptr.vmem [resolvable:$true] %s40_s8 }
   0x8   :  { %43 = dma.hbm_to_vmem [thread:$0]  %s39_s28, 64, %s41_s8, [#allocation6]  }
   0x9   :  { %327 = dma.done.wait [#allocation3], 256  }
   0xa   :  { %328 = vsyncadd [#allocation3], 4294967040 }
   0xb   :  { %329 = dma.done.wait [#allocation6], 64  }
   0xc   :  { %330 = vsyncadd [#allocation6], 4294967232  ;;  %v56_v0 = vld [vmem:[#allocation2 + $0x8] sm:$0xff]  ;;  %v55_v1 = vld [vmem:[#allocation2] sm:$0xff]  ;;  %vm57_vm0 = vcmask 130048   ;;  %vm83_vm1 = vcmask 261120  }
   0xd   :  { %75 = vmatpush.msra.mxu0 %v56_v0  ;;  %v54_v2 = vld [vmem:[%s418_s0] sm:$0xff]  ;;  %v126_v20 = vld [vmem:[%s420_s2 + $0x18] sm:$0xff]  ;;  %v125_v23 = vld [vmem:[%s420_s2 + $0x10] sm:$0xff]  ;;  %s337_s24 = smov [#allocation7]   ;;  %s231_s28 = sshll.u32 %s424_s6, 4  ;;  %vm222_vm8 = vcmask 64512   ;;  %s232_s28 = int_to_ptr.hbm [resolvable:$true] %s231_s28 }
   0xe   :  { %142 = vmatpush.msra.mxu1 %v126_v20  ;;  %v124_v25 = vld [vmem:[%s420_s2 + $0x8] sm:$0xff]  ;;  %v123_v26 = vld [vmem:[%s420_s2] sm:$0xff]  ;;  %v81_v34 = vld [vmem:[#allocation5] sm:$0x1]  ;;  %s229_s25 = sshll.u32 %s337_s24, 4  ;;  %s230_s25 = int_to_ptr.vmem [resolvable:$true] %s229_s25 }
   0xf   :  { %76 = vmatpush.msra.mxu0 %v55_v1  ;;  %v82_v38 = vld [vmem:[#allocation5 + $0x1] sm:$0x1]  ;;  %v194_v63 = vld [vmem:[%s421_s3 + $0x18] sm:$0xff] }
  0x10   :  { %242 = vmatmul.msk.f32.vlgmr.msra.gmra.mxu0 %vm57_vm0, %v54_v2  ;;  %143 = vmatpush.msra.mxu1 %v125_v23  ;;  %v193_v2 = vld [vmem:[%s421_s3 + $0x10] sm:$0xff] }
  0x11   :  { %214 = vmatpush.msra.mxu2 %v194_v63 }
  0x12   :  { %144 = vmatpush.msra.mxu1 %v124_v25  ;;  %v250_v25 = vld [vmem:[%s423_s5] ss:$0 sm:$0xff] }
  0x13   :  { %215 = vmatpush.msra.mxu2 %v193_v2 }
  0x14   :  { %145 = vmatpush.msra.mxu1 %v123_v26 }
  0x8d   :  { %v78_v3 = vpop.f32.mrf.mxu0 }
  0x8e   :  { %v84_v4 = vsel %vm83_vm1, %v78_v3, 0.0  ;;  %v91_v5 = vmul.f32 %v78_v3, %v78_v3 }
  0x8f   :  { %v85_v6 = vrot.slane %v84_v4, 4 }
  0x90   :  { %v92_v7 = vsel %vm83_vm1, %v91_v5, 0.0  ;;  %v191_v5 = vld [vmem:[%s421_s3] sm:$0xff] }
  0x91   :  { %v86_v8 = vadd.f32 %v85_v6, %v84_v4  ;;  %v93_v9 = vrot.slane %v92_v7, 4  ;;  %v192_v4 = vld [vmem:[%s421_s3 + $0x8] sm:$0xff] }
  0x92   :  { %216 = vmatpush.msra.mxu2 %v192_v4 }
  0x93   :  { %v87_v10 = vrot.slane %v86_v8, 2  ;;  %v94_v11 = vadd.f32 %v93_v9, %v92_v7 }
  0x94   :  { %217 = vmatpush.msra.mxu2 %v191_v5 }
  0x95   :  { %v88_v12 = vadd.f32 %v87_v10, %v86_v8  ;;  %v95_v13 = vrot.slane %v94_v11, 2 }
  0x97   :  { %v89_v14 = vrot.slane %v88_v12, 1  ;;  %v96_v15 = vadd.f32 %v95_v13, %v94_v11  ;;  %v150_v13 = vld [vmem:[#allocation5 + $0x2] sm:$0x1] }
  0x99   :  { %v90_v16 = vadd.f32 %v89_v14, %v88_v12  ;;  %v97_v17 = vrot.slane %v96_v15, 1 }
  0x9b   :  { %v98_v18 = vadd.f32 %v97_v17, %v96_v15  ;;  %v99_v19 = vmul.f32 0.125, %v90_v16  ;;  %v151_v17 = vld [vmem:[#allocation5 + $0x3] sm:$0x1] }
  0x9d   :  { %v100_v21 = vmul.f32 0.125, %v98_v18  ;;  %v101_v22 = vmul.f32 %v99_v19, %v99_v19 }
  0x9f   :  { %v102_v24 = vsub.f32 %v100_v21, %v101_v22 }
  0xa1   :  { %v103_v27 = vmax.f32 %v102_v24, 0.0 }
  0xa3   :  { %v104_v28 = vadd.f32 1e-05, %v103_v27 }
  0xa5   :  { %251 = vrsqrt.f32 %v104_v28  ;;  %vm111_vm3 = vweird.f32 %v104_v28 }
  0xab   :  { %v252_v29 = vpop.eup %251 }
  0xac   :  { %v106_v30 = vmul.f32 %v252_v29, %v104_v28  ;;  %vm112_vm2 = vweird.f32 %v252_v29 }
  0xad   :  { %vm113_vm4 = vmor %vm111_vm3, %vm112_vm2 }
  0xae   :  { %v107_v31 = vmul.f32 %v252_v29, %v106_v30 }
  0xb0   :  { %v108_v32 = vmul.f32 0.5, %v107_v31 }
  0xb2   :  { %v109_v33 = vsub.f32 1.5, %v108_v32 }
  0xb4   :  { %v110_v35 = vmul.f32 %v252_v29, %v109_v33 }
  0xb6   :  { %v114_v36 = vsel %vm113_vm4, %v252_v29, %v110_v35 }
  0xb7   :  { %v115_v37 = vmul.f32 %v114_v36, %v81_v34 }
  0xb9   :  { %v116_v39 = vmul.f32 %v115_v37, %v99_v19  ;;  %v118_v40 = vperm.slane %v115_v37, 0 }
  0xbb   :  { %v117_v41 = vsub.f32 %v82_v38, %v116_v39  ;;  %v119_v42 = vmul.f32 %v118_v40, %v78_v3 }
  0xbd   :  { %v120_v43 = vperm.slane %v117_v41, 0 }
  0xbf   :  { %v121_v44 = vadd.f32 %v120_v43, %v119_v42 }
  0xc1   :  { %v122_v45 = vmax.f32 %v121_v44, 0.0 }
  0xc3   :  { %243 = vmatmul.msk.f32.vlgmr.msra.gmra.mxu1 %vm83_vm1, %v122_v45 }
 0x140   :  { %v147_v46 = vpop.f32.mrf.mxu1 }
 0x141   :  { %v152_v47 = vsel %vm83_vm1, %v147_v46, 0.0  ;;  %v159_v48 = vmul.f32 %v147_v46, %v147_v46 }
 0x142   :  { %v153_v49 = vrot.slane %v152_v47, 4 }
 0x143   :  { %v160_v50 = vsel %vm83_vm1, %v159_v48, 0.0 }
 0x144   :  { %v154_v51 = vadd.f32 %v153_v49, %v152_v47  ;;  %v161_v52 = vrot.slane %v160_v50, 4 }
 0x146   :  { %v155_v53 = vrot.slane %v154_v51, 2  ;;  %v162_v54 = vadd.f32 %v161_v52, %v160_v50 }
 0x148   :  { %v156_v55 = vadd.f32 %v155_v53, %v154_v51  ;;  %v163_v56 = vrot.slane %v162_v54, 2 }
 0x14a   :  { %v157_v57 = vrot.slane %v156_v55, 1  ;;  %v164_v58 = vadd.f32 %v163_v56, %v162_v54 }
 0x14c   :  { %v158_v59 = vadd.f32 %v157_v57, %v156_v55  ;;  %v165_v60 = vrot.slane %v164_v58, 1 }
 0x14e   :  { %v166_v61 = vadd.f32 %v165_v60, %v164_v58  ;;  %v167_v62 = vmul.f32 0.125, %v158_v59 }
 0x150   :  { %v168_v0 = vmul.f32 0.125, %v166_v61  ;;  %v169_v1 = vmul.f32 %v167_v62, %v167_v62 }
 0x152   :  { %v170_v3 = vsub.f32 %v168_v0, %v169_v1 }
 0x154   :  { %v171_v6 = vmax.f32 %v170_v3, 0.0 }
 0x156   :  { %v172_v7 = vadd.f32 1e-05, %v171_v6 }
 0x158   :  { %253 = vrsqrt.f32 %v172_v7  ;;  %vm179_vm6 = vweird.f32 %v172_v7 }
 0x15e   :  { %v254_v8 = vpop.eup %253 }
 0x15f   :  { %v174_v9 = vmul.f32 %v254_v8, %v172_v7  ;;  %vm180_vm5 = vweird.f32 %v254_v8 }
 0x160   :  { %vm181_vm7 = vmor %vm179_vm6, %vm180_vm5 }
 0x161   :  { %v175_v10 = vmul.f32 %v254_v8, %v174_v9 }
 0x163   :  { %v176_v11 = vmul.f32 0.5, %v175_v10 }
 0x165   :  { %v177_v12 = vsub.f32 1.5, %v176_v11 }
 0x167   :  { %v178_v14 = vmul.f32 %v254_v8, %v177_v12 }
 0x169   :  { %v182_v15 = vsel %vm181_vm7, %v254_v8, %v178_v14 }
 0x16a   :  { %v183_v16 = vmul.f32 %v182_v15, %v150_v13 }
 0x16c   :  { %v184_v18 = vmul.f32 %v183_v16, %v167_v62  ;;  %v186_v19 = vperm.slane %v183_v16, 0 }
 0x16e   :  { %v185_v20 = vsub.f32 %v151_v17, %v184_v18  ;;  %v187_v21 = vmul.f32 %v186_v19, %v147_v46 }
 0x170   :  { %v188_v22 = vperm.slane %v185_v20, 0 }
 0x172   :  { %v189_v23 = vadd.f32 %v188_v22, %v187_v21 }
 0x174   :  { %v190_v24 = vmax.f32 %v189_v23, 0.0 }
 0x176   :  { %244 = vmatmul.msk.f32.vlgmr.msra.gmra.mxu2 %vm83_vm1, %v190_v24 }
 0x1f9   :  { %v219_v26 = vpop.f32.mrf.mxu2 }
 0x1fa   :  { %v220_v27 = vadd.f32 %v250_v25, %v219_v26 }
 0x1fc   :  { %223 = vst.msk [vmem:[#allocation7] sm:$0xff] %vm222_vm8, %v220_v27 }
 0x1fd   :  { %234 = dma.vmem_to_hbm [thread:$0]  %s230_s25, 128, %s232_s28, [#allocation4]  }
 0x1fe   :  { %331 = dma.done.wait [#allocation4], 128  }
 0x1ff   :  { %332 = vsyncadd [#allocation4], 4294967168 }
 0x200   :  { %239 = vsyncpa [#allocation3], 1 }
 0x201   :  { %240 = vsyncpa [#allocation6], 1 }
 0x202   :  { %241 = vsyncpa [#allocation4], 1 }

</bundles_post_ra>
